<compile_context>
chip_gen: v5e
topology: v5e:2x2
jax: 0.10.0
libtpu: 0.0.40
codegen_flags: <defaults>
</compile_context>

<pallas_src>
import functools
import math

import jax
import jax.numpy as jnp
from jax.experimental import pallas as pl
from jax.experimental.pallas import tpu as pltpu


def _sdpa_kernel(q_ref, k_ref, v_ref, out_ref, attn_ref, *, inv_temper,
                 use_bf16_matmul):
    """One (batch-tile, query-tile) grid step.

    q_ref:   (TB, TQ, D)    k_ref/v_ref: (TB, L, D)   (bf16 on the fast path)
    out_ref: (TB, TQ, D)    attn_ref:    (TB, TQ, L)
    """
    # Fold the 1/sqrt(d_model) scale into q (TQ*D mults instead of TQ*L).
    q = q_ref[...].astype(jnp.float32) * inv_temper
    k = k_ref[...]
    v = v_ref[...]

    if use_bf16_matmul:
        # k/v were already cast to bf16 in the wrapper -> these are no-ops for
        # them; only the scaled q tile actually gets converted here.
        q_mm, k_mm = q.astype(jnp.bfloat16), k.astype(jnp.bfloat16)
    else:
        q_mm, k_mm = q, k.astype(jnp.float32)

    # attn[b, i, j] = q[b, i, :] . k[b, j, :]; contraction on the last dim of
    # both operands feeds the MXU directly (no explicit k transpose).
    scores = jnp.einsum("bqd,bkd->bqk", q_mm, k_mm,
                        preferred_element_type=jnp.float32)

    # Numerically stable softmax over keys, kept in f32.
    scores = scores - jnp.max(scores, axis=-1, keepdims=True)
    e = jnp.exp(scores)
    denom = jnp.sum(e, axis=-1, keepdims=True)
    # Exact reciprocal only when the caller wants f32 attention weights; when
    # attn is emitted in bf16 the EUP approximation (~1e-3) is below the
    # bf16 storage rounding anyway and the normalization becomes nearly free.
    approx_recip = attn_ref.dtype != jnp.float32
    attn = e * pl.reciprocal(denom, approx=approx_recip)

    # TODO(synk): nn.Dropout(attn_dropout) is identity at inference; not applied.

    p = attn.astype(jnp.bfloat16) if use_bf16_matmul else attn
    out = jnp.einsum("bqk,bkd->bqd", p, v.astype(p.dtype),
                     preferred_element_type=jnp.float32)

    attn_ref[...] = attn.astype(attn_ref.dtype)
    out_ref[...] = out.astype(out_ref.dtype)


def _vmem_budgets():
    """Per-generation (block_budget, vmem_limit) in bytes."""
    cap = 64 * 1024 * 1024  # conservative fallback (v7x physical VMEM)
    try:
        info = pltpu.get_tpu_info()
        cap = int(getattr(info, "vmem_capacity_bytes", cap)) or cap
    except Exception:  # pragma: no cover - info query unavailable
        pass
    # 128 MiB parts (v5e/v6e): ~96 MiB scoped limit / 48 MiB block budget.
    # 64 MiB parts (v7x):       48 MiB scoped limit / 24 MiB block budget.
    vmem_limit = min(cap * 3 // 4, 100 * 1024 * 1024)
    return vmem_limit // 2, vmem_limit


def _choose_tiles(B, L, D, *, q_isz, kv_isz, out_isz, attn_isz, block_budget):
    """Pick (TB, TQ): batch elements / query rows processed per grid step."""
    gran = 16  # multiple of 16 keeps both f32 (8,128) and bf16 (16,128) tiling happy

    def block_bytes(tb, tq):
        # Double-buffered BlockSpec tiles: q + out + attn scale with tq,
        # k + v stay resident per batch tile (constant index along query axis).
        spec = 2 * tb * (tq * D * (q_isz + out_isz)
                         + tq * L * attn_isz
                         + 2 * L * D * kv_isz)
        # In-kernel intermediates (single-buffered): f32 scores + exp + attn
        # (+ a bf16 copy of p) and the scaled / bf16 q tile + f32 out accum.
        inter = tb * (tq * L * 14 + tq * D * 10)
        return spec + inter

    # Query tile: full L when it fits the fast regime, otherwise up to 512 rows
    # (larger tiles amortize the ~0.35 us per-grid-step overhead and give long
    # lane-dense attn/out store streams).
    TQ = L if L <= 512 else 512

    # Amortize per-step overhead for tiny per-batch problems by packing several
    # batch elements into one grid step.
    TB = 1
    if TQ == L:
        while TB < B and block_bytes(TB * 2, TQ) <= block_budget:
            TB *= 2
        TB = min(TB, B)

    # Shrink the query tile (keeping it a multiple of 16) if still too large.
    while TQ > gran and block_bytes(TB, TQ) > block_budget:
        TQ = max(gran, (TQ // 2) // gran * gran)

    # TODO(synk): for very long L the resident (TB, L, D) k/v slabs can still
    # exceed VMEM; a key-streaming (inner K-axis / manual DMA) variant is the
    # next step for that regime.
    return TB, TQ


def scaled_dot_product_attention(q, k, v, mask=None, d_model=None,
                                 use_bf16_matmul=True, attn_dtype=None):
    """q, k, v: (B, L, D). Returns (output (B, L, D), attn (B, L, L)).

    `mask` is accepted for API parity but IGNORED: the original module's mask
    branch is a no-op (no causal/padding masking is ever applied).

    Fast defaults: bf16 MXU operands (f32 accumulation, f32 softmax) and bf16
    attention weights. For bit-tighter results pass use_bf16_matmul=False
    (f32 operands, attn returned in q.dtype).
    """
    del mask  # no-op branch in the original forward
    B, L, D = q.shape
    if d_model is None:
        d_model = D
    inv_temper = 1.0 / float(math.sqrt(d_model))

    out_dtype = q.dtype
    if attn_dtype is None:
        attn_dtype = jnp.bfloat16 if use_bf16_matmul else q.dtype
    attn_dtype = jnp.dtype(attn_dtype)

    if use_bf16_matmul:
        # Cast the resident k/v slabs once here: halves their HBM DMA and VMEM
        # footprint and avoids re-casting them on every query tile.
        k = k.astype(jnp.bfloat16)
        v = v.astype(jnp.bfloat16)

    q_isz = jnp.dtype(q.dtype).itemsize
    kv_isz = jnp.dtype(k.dtype).itemsize
    out_isz = jnp.dtype(out_dtype).itemsize
    attn_isz = attn_dtype.itemsize

    block_budget, vmem_limit = _vmem_budgets()
    TB, TQ = _choose_tiles(B, L, D, q_isz=q_isz, kv_isz=kv_isz,
                           out_isz=out_isz, attn_isz=attn_isz,
                           block_budget=block_budget)
    grid = (pl.cdiv(B, TB), pl.cdiv(L, TQ))

    kernel = functools.partial(
        _sdpa_kernel, inv_temper=inv_temper, use_bf16_matmul=use_bf16_matmul)

    cost = pl.CostEstimate(
        flops=4 * B * L * L * D,                      # QK^T + PV
        transcendentals=B * L * L,                    # exp in softmax
        bytes_accessed=(B * L * D * (q_isz + 2 * kv_isz + out_isz)
                        + B * L * L * attn_isz),      # attn writeback dominates
    )

    out, attn = pl.pallas_call(
        kernel,
        out_shape=(
            jax.ShapeDtypeStruct((B, L, D), out_dtype),
            jax.ShapeDtypeStruct((B, L, L), attn_dtype),
        ),
        grid=grid,
        in_specs=[
            pl.BlockSpec((TB, TQ, D), lambda b, i: (b, i, 0)),
            # k/v block index is constant along the query axis -> the same
            # (TB, L, D) slab stays resident across consecutive query tiles.
            pl.BlockSpec((TB, L, D), lambda b, i: (b, 0, 0)),
            pl.BlockSpec((TB, L, D), lambda b, i: (b, 0, 0)),
        ],
        out_specs=(
            pl.BlockSpec((TB, TQ, D), lambda b, i: (b, i, 0)),
            pl.BlockSpec((TB, TQ, L), lambda b, i: (b, i, 0)),
        ),
        compiler_params=pltpu.CompilerParams(
            # Query tiles are fully independent (no cross-step accumulation),
            # so both axes can be sharded across v7x's two TensorCores.
            dimension_semantics=("parallel", "parallel"),
            vmem_limit_bytes=vmem_limit,
        ),
        cost_estimate=cost,
    )(q, k, v)
    return out, attn


def _reference(q, k, v, temper):
    scores = jnp.einsum("bid,bjd->bij", q, k) / temper
    attn = jax.nn.softmax(scores, axis=-1)
    out = jnp.einsum("bij,bjd->bid", attn, v)
    return out, attn


if __name__ == "__main__":
    B, L, D = 2, 8, 32  # d_model = 32
    key = jax.random.PRNGKey(0)
    kq, kk, kv = jax.random.split(key, 3)
    q = jax.random.normal(kq, (B, L, D), dtype=jnp.float32)
    k = jax.random.normal(kk, (B, L, D), dtype=jnp.float32)
    v = jax.random.normal(kv, (B, L, D), dtype=jnp.float32)

    ref_out, ref_attn = _reference(q, k, v, math.sqrt(D))

    # Exact path (f32 MXU operands, f32 attn): tight tolerance.
    out, attn = scaled_dot_product_attention(q, k, v, mask=None, d_model=D,
                                             use_bf16_matmul=False)
    out, attn = jax.block_until_ready((out, attn))
    assert jnp.allclose(out, ref_out, atol=1e-5, rtol=1e-5)
    assert jnp.allclose(attn, ref_attn, atol=1e-5, rtol=1e-5)

    # Default fast path (bf16 operands, f32 accumulate/softmax, bf16 attn out):
    # looser tolerance.
    out_f, attn_f = scaled_dot_product_attention(q, k, v, mask=None, d_model=D)
    out_f, attn_f = jax.block_until_ready((out_f, attn_f))
    assert out_f.dtype == q.dtype
    assert jnp.allclose(out_f, ref_out, atol=5e-2, rtol=5e-2)
    assert jnp.allclose(attn_f.astype(jnp.float32), ref_attn,
                        atol=5e-2, rtol=5e-2)

    print("KERNEL_OK")
</pallas_src>

<mosaic_0001>
module attributes {stable_mosaic.version = 11 : i64} {
  func.func @_sdpa_kernel(%arg0: i32, %arg1: i32, %arg2: memref<2x8x32xf32, #tpu.memory_space<vmem>>, %arg3: memref<2x8x32xf32, #tpu.memory_space<vmem>>, %arg4: memref<2x8x32xf32, #tpu.memory_space<vmem>>, %arg5: memref<2x8x32xf32, #tpu.memory_space<vmem>>, %arg6: memref<2x8x8xf32, #tpu.memory_space<vmem>>) attributes {dimension_semantics = [#tpu.dimension_semantics<parallel>, #tpu.dimension_semantics<parallel>], iteration_bounds = array<i64: 1, 1>, scalar_prefetch = 0 : i64, scratch_operands = 0 : i64, tpu.core_type = #tpu.core_type<tc>, window_params = [{transform_indices = @transform_0, window_bounds = array<i64: 2, 8, 32>}, {transform_indices = @transform_1, window_bounds = array<i64: 2, 8, 32>}, {transform_indices = @transform_2, window_bounds = array<i64: 2, 8, 32>}, {transform_indices = @transform_3, window_bounds = array<i64: 2, 8, 32>}, {transform_indices = @transform_4, window_bounds = array<i64: 2, 8, 8>}]} {
    %c0 = arith.constant 0 : index
    %c0_0 = arith.constant 0 : index
    %c0_1 = arith.constant 0 : index
    %0 = vector.load %arg2[%c0, %c0_0, %c0_1] : memref<2x8x32xf32, #tpu.memory_space<vmem>>, vector<2x8x32xf32>
    %cst = arith.constant 0.176776692 : f32
    %1 = vector.broadcast %cst : f32 to vector<2x8x32xf32>
    %2 = arith.mulf %0, %1 : vector<2x8x32xf32>
    %c0_2 = arith.constant 0 : index
    %c0_3 = arith.constant 0 : index
    %c0_4 = arith.constant 0 : index
    %3 = vector.load %arg3[%c0_2, %c0_3, %c0_4] : memref<2x8x32xf32, #tpu.memory_space<vmem>>, vector<2x8x32xf32>
    %c0_5 = arith.constant 0 : index
    %c0_6 = arith.constant 0 : index
    %c0_7 = arith.constant 0 : index
    %4 = vector.load %arg4[%c0_5, %c0_6, %c0_7] : memref<2x8x32xf32, #tpu.memory_space<vmem>>, vector<2x8x32xf32>
    "tpu.trace_start"() <{level = 10 : i32, message = "bqd,bkd->bqk"}> : () -> ()
    %cst_8 = arith.constant dense<0.000000e+00> : vector<2x8x8xf32>
    %5 = tpu.matmul %2, %3, %cst_8 {dimension_numbers = #tpu.dot_dimension_numbers<[2], [2], [1], [1], [0, 0, 0, 1, 1, 1], [0], [0]>} : vector<2x8x32xf32>, vector<2x8x32xf32>, vector<2x8x8xf32> -> vector<2x8x8xf32>
    "tpu.trace_stop"() : () -> ()
    %cst_9 = arith.constant dense<0xFF800000> : vector<2x8xf32>
    %6 = vector.multi_reduction <maximumf>, %5, %cst_9 [2] : vector<2x8x8xf32> to vector<2x8xf32>
    %7 = vector.shape_cast %6 : vector<2x8xf32> to vector<2x8x1xf32>
    %8 = vector.broadcast %7 : vector<2x8x1xf32> to vector<2x8x8xf32>
    %9 = arith.subf %5, %8 : vector<2x8x8xf32>
    %10 = math.exp %9 : vector<2x8x8xf32>
    %cst_10 = arith.constant dense<0.000000e+00> : vector<2x8xf32>
    %11 = vector.multi_reduction <add>, %10, %cst_10 [2] : vector<2x8x8xf32> to vector<2x8xf32>
    %12 = vector.shape_cast %11 : vector<2x8xf32> to vector<2x8x1xf32>
    %13 = tpu.reciprocal %12 : vector<2x8x1xf32> -> vector<2x8x1xf32>
    %14 = vector.broadcast %13 : vector<2x8x1xf32> to vector<2x8x8xf32>
    %15 = arith.mulf %10, %14 : vector<2x8x8xf32>
    "tpu.trace_start"() <{level = 10 : i32, message = "bqk,bkd->bqd"}> : () -> ()
    %cst_11 = arith.constant dense<0.000000e+00> : vector<2x8x32xf32>
    %16 = tpu.matmul %15, %4, %cst_11 {dimension_numbers = #tpu.dot_dimension_numbers<[2], [1], [1], [2], [0, 0, 0, 1, 1, 2], [0], [0]>} : vector<2x8x8xf32>, vector<2x8x32xf32>, vector<2x8x32xf32> -> vector<2x8x32xf32>
    "tpu.trace_stop"() : () -> ()
    %c0_12 = arith.constant 0 : index
    %c0_13 = arith.constant 0 : index
    %c0_14 = arith.constant 0 : index
    %17 = vector.load %arg6[%c0_12, %c0_13, %c0_14] : memref<2x8x8xf32, #tpu.memory_space<vmem>>, vector<2x8x8xf32>
    tpu.vector_store %arg6[%c0_12, %c0_13, %c0_14], %15 {strides = array<i32>} : memref<2x8x8xf32, #tpu.memory_space<vmem>>, vector<2x8x8xf32>,
    %c0_15 = arith.constant 0 : index
    %c0_16 = arith.constant 0 : index
    %c0_17 = arith.constant 0 : index
    %18 = vector.load %arg5[%c0_15, %c0_16, %c0_17] : memref<2x8x32xf32, #tpu.memory_space<vmem>>, vector<2x8x32xf32>
    tpu.vector_store %arg5[%c0_15, %c0_16, %c0_17], %16 {strides = array<i32>} : memref<2x8x32xf32, #tpu.memory_space<vmem>>, vector<2x8x32xf32>,
    return
  }
  func.func @transform_0(%arg0: i32, %arg1: i32) -> (i32, i32, i32) {
    %c0_i32 = arith.constant 0 : i32
    %c0_i32_0 = arith.constant 0 : i32
    return %arg0, %arg1, %c0_i32 : i32, i32, i32
  }
  func.func @transform_1(%arg0: i32, %arg1: i32) -> (i32, i32, i32) {
    %c0_i32 = arith.constant 0 : i32
    %c0_i32_0 = arith.constant 0 : i32
    %c0_i32_1 = arith.constant 0 : i32
    return %arg0, %c0_i32, %c0_i32_0 : i32, i32, i32
  }
  func.func @transform_2(%arg0: i32, %arg1: i32) -> (i32, i32, i32) {
    %c0_i32 = arith.constant 0 : i32
    %c0_i32_0 = arith.constant 0 : i32
    %c0_i32_1 = arith.constant 0 : i32
    return %arg0, %c0_i32, %c0_i32_0 : i32, i32, i32
  }
  func.func @transform_3(%arg0: i32, %arg1: i32) -> (i32, i32, i32) {
    %c0_i32 = arith.constant 0 : i32
    %c0_i32_0 = arith.constant 0 : i32
    return %arg0, %arg1, %c0_i32 : i32, i32, i32
  }
  func.func @transform_4(%arg0: i32, %arg1: i32) -> (i32, i32, i32) {
    %c0_i32 = arith.constant 0 : i32
    %c0_i32_0 = arith.constant 0 : i32
    return %arg0, %arg1, %c0_i32 : i32, i32, i32
  }
}

</mosaic_0001>

<bundles_post_ra>
// kernel: tpu_custom_call.1
= control target key start
LH: loop header
LB: loop body
LE: loop exit
PB: predicated region body
PF: predicated region fallthrough
CT: control target
= control target key end

     0   :  { %10 = vsyncpa [#allocation3], 0  ;;  %s488_s0 = inlined_call_operand.hbm [shape: f32[2,8,32], index: 0, kind: input, shape index: {}]   ;;  %s489_s1 = inlined_call_operand.hbm [shape: f32[2,8,32], index: 1, kind: input, shape index: {}]   ;;  %s490_s2 = inlined_call_operand.hbm [shape: f32[2,8,32], index: 2, kind: input, shape index: {}]   ;;  %s491_s3 = inlined_call_operand.hbm [shape: f32[2,8,32], index: 3, kind: output, shape index: {0}]   ;;  %s492_s4 = inlined_call_operand.hbm [shape: f32[2,8,8], index: 4, kind: output, shape index: {1}]  }
   0x1   :  { %11 = vsyncpa [#allocation6], 0 }
   0x2   :  { %12 = vsyncpa [#allocation4], 0 }
   0x3   :  { %13 = vsyncpa [#allocation10], 0  ;;  %s31_s17 = sshll.u32 %s489_s1, 4  ;;  %s412_s18 = smov [#allocation5]   ;;  %s32_s17 = int_to_ptr.hbm [resolvable:$true] %s31_s17 }
   0x4   :  { %s33_s19 = sshll.u32 %s412_s18, 4  ;;  %s18_s22 = sshll.u32 %s488_s0, 4  ;;  %s34_s19 = int_to_ptr.vmem [resolvable:$true] %s33_s19  ;;  %s19_s22 = int_to_ptr.hbm [resolvable:$true] %s18_s22 }
   0x5   :  { %s413_s23 = smov 128   ;;  %s414_s24 = smov 8  }
   0x6   :  { %39 = dma.hbm_to_vmem [thread:$0]  %s32_s17, 256, %s34_s19, [#allocation6], %s413_s23, %s413_s23, %s414_s24  }
   0x7   :  { %s415_s25 = smov [#allocation2]   ;;  %s44_s1 = sshll.u32 %s490_s2, 4  ;;  %s45_s1 = int_to_ptr.hbm [resolvable:$true] %s44_s1 }
   0x8   :  { %s20_s26 = sshll.u32 %s415_s25, 4  ;;  %s416_s0 = smov [#allocation7]   ;;  %s21_s26 = int_to_ptr.vmem [resolvable:$true] %s20_s26 }
   0x9   :  { %26 = dma.hbm_to_vmem [thread:$0]  %s19_s22, 256, %s21_s26, [#allocation3], %s413_s23, %s413_s23, %s414_s24  }
   0xa   :  { %s46_s29 = sshll.u32 %s416_s0, 4  ;;  %s47_s29 = int_to_ptr.vmem [resolvable:$true] %s46_s29 }
   0xb   :  { %52 = dma.hbm_to_vmem [thread:$0]  %s45_s1, 256, %s47_s29, [#allocation6], %s413_s23, %s413_s23, %s414_s24  }
   0xc   :  { %404 = dma.done.wait [#allocation3], 256  }
   0xd   :  { %405 = vsyncadd [#allocation3], 4294967040 }
   0xe   :  { %406 = dma.done.wait [#allocation6], 512  }
   0xf   :  { %407 = vsyncadd [#allocation6], 4294966784  ;;  %vm73_vm0 = vcmask 261120   ;;  %v69_v0 = vld [vmem:[#allocation5] sm:$0xff]  ;;  %v65_v1 = vld [vmem:[#allocation2] sm:$0xff]  ;;  %vm126_vm1 = vcmask 64512  }
  0x10   :  { %v70_v2 = vld [vmem:[#allocation5 + $0x8] sm:$0xff]  ;;  %263 = vmatpush.xpose.msk.msra.mxu0 %vm73_vm0, %v69_v0  ;;  %v67_v3 = vmul.f32 0.17677669, %v65_v1  ;;  %v66_v4 = vld [vmem:[#allocation2 + $0x8] sm:$0xff]  ;;  %v71_v20 = vld [vmem:[#allocation7] sm:$0xff]  ;;  %s417_s2 = smov [#allocation9]  }
  0x11   :  { %265 = vmatpush.xpose.msk.msra.mxu1 %vm73_vm0, %v70_v2  ;;  %v68_v5 = vmul.f32 0.17677669, %v66_v4  ;;  %193 = vmatpush.msra.mxu2 %v71_v20  ;;  %v72_v21 = vld [vmem:[#allocation7 + $0x8] sm:$0xff]  ;;  %s242_s30 = sshll.u32 %s417_s2, 4  ;;  %s244_s7 = sshll.u32 %s492_s4, 4  ;;  %s243_s30 = int_to_ptr.vmem [resolvable:$true] %s242_s30  ;;  %s245_s7 = int_to_ptr.hbm [resolvable:$true] %s244_s7 }
  0x12   :  { %216 = vmatpush.msra.mxu3 %v72_v21  ;;  %s418_s8 = smov [#allocation8]   ;;  %s231_s12 = sshll.u32 %s491_s3, 4  ;;  %s232_s12 = int_to_ptr.hbm [resolvable:$true] %s231_s12 }
  0x13   :  { %264 = vmatmul.msk.f32.vlgmr.msra.gmra.mxu0 %vm73_vm0, %v67_v3  ;;  %s229_s9 = sshll.u32 %s418_s8, 4  ;;  %s230_s9 = int_to_ptr.vmem [resolvable:$true] %s229_s9 }
  0x14   :  { %266 = vmatmul.msk.f32.vlgmr.msra.gmra.mxu1 %vm73_vm0, %v68_v5 }
  0x90   :  { %v97_v6 = vpop.f32.mrf.mxu0 }
  0x91   :  { %v127_v7 = vsel %vm126_vm1, %v97_v6, -inf  ;;  %v123_v8 = vpop.f32.mrf.mxu1 }
  0x92   :  { %128 = vmax.xlane.f32.xlu0 %v127_v7  ;;  %v130_v9 = vsel %vm126_vm1, %v123_v8, -inf }
  0x9a   :  { %131 = vmax.xlane.f32.xlu0 %v130_v9 }
 0x105   :  { %v129_v10 = vpop.xlane.xlu0 %128 }
 0x106   :  { %v133_v11 = vsub.f32 %v97_v6, %v129_v10 }
 0x108   :  { %v135_v12 = vmul.f32 1.442695, %v133_v11 }
 0x10a   :  { %276 = vpow2.f32 %v135_v12 }
 0x10d   :  { %v132_v13 = vpop.xlane.xlu0 %131 }
 0x10e   :  { %v134_v14 = vsub.f32 %v123_v8, %v132_v13 }
 0x110   :  { %v277_v15 = vpop.eup %276  ;;  %v137_v16 = vmul.f32 1.442695, %v134_v14 }
 0x111   :  { %v139_v17 = vsel %vm126_vm1, %v277_v15, 0.0 }
 0x112   :  { %278 = vpow2.f32 %v137_v16  ;;  %140 = vadd.xlane.f32.xlu1 %v139_v17 }
 0x118   :  { %v279_v18 = vpop.eup %278 }
 0x119   :  { %v142_v19 = vsel %vm126_vm1, %v279_v18, 0.0 }
 0x11a   :  { %143 = vadd.xlane.f32.xlu1 %v142_v19 }
 0x185   :  { %v141_v22 = vpop.xlane.xlu1 %140 }
 0x186   :  { %280 = vrcp.f32 %v141_v22  ;;  %v156_v27 = vand.u32 2147483648, %v141_v22  ;;  %v154_v29 = vand.u32 2147483647, %v141_v22  ;;  %vm150_vm3 = vweird.f32 %v141_v22 }
 0x188   :  { %v157_v32 = vor.u32 1.1754944e-38, %v156_v27  ;;  %vm155_vm5 = vcmp.eq.f32.partialorder %v154_v29, 8.507059e+37 }
 0x18c   :  { %v281_v23 = vpop.eup %280 }
 0x18d   :  { %v146_v24 = vmul.f32 %v281_v23, %v141_v22  ;;  %v144_v25 = vpop.xlane.xlu1 %143  ;;  %vm151_vm2 = vweird.f32 %v281_v23 }
 0x18e   :  { %282 = vrcp.f32 %v144_v25  ;;  %vm152_vm4 = vmor %vm150_vm3, %vm151_vm2  ;;  %v170_v38 = vand.u32 2147483648, %v144_v25  ;;  %v168_v40 = vand.u32 2147483647, %v144_v25  ;;  %vm164_vm7 = vweird.f32 %v144_v25 }
 0x18f   :  { %v147_v26 = vsub.f32 1.0, %v146_v24 }
 0x190   :  { %v171_v42 = vor.u32 1.1754944e-38, %v170_v38  ;;  %vm169_vm9 = vcmp.eq.f32.partialorder %v168_v40, 8.507059e+37 }
 0x191   :  { %v148_v28 = vmul.f32 %v281_v23, %v147_v26 }
 0x193   :  { %v149_v30 = vadd.f32 %v281_v23, %v148_v28 }
 0x194   :  { %v283_v31 = vpop.eup %282 }
 0x195   :  { %v160_v33 = vmul.f32 %v283_v31, %v144_v25  ;;  %v153_v34 = vsel %vm152_vm4, %v281_v23, %v149_v30  ;;  %vm165_vm6 = vweird.f32 %v283_v31 }
 0x196   :  { %v158_v35 = vsel %vm155_vm5, %v157_v32, %v153_v34  ;;  %vm166_vm8 = vmor %vm164_vm7, %vm165_vm6 }
 0x197   :  { %v161_v36 = vsub.f32 1.0, %v160_v33  ;;  %v173_v37 = vmul.f32 %v277_v15, %v158_v35 }
 0x199   :  { %v162_v39 = vmul.f32 %v283_v31, %v161_v36  ;;  %267 = vmatmul.msk.f32.vlgmr.msra.gmra.mxu2 %vm126_vm1, %v173_v37  ;;  %221 = vst.msk [vmem:[#allocation9] sm:$0xff] %vm126_vm1, %v173_v37 }
 0x19b   :  { %v163_v41 = vadd.f32 %v283_v31, %v162_v39 }
 0x19d   :  { %v167_v43 = vsel %vm166_vm8, %v283_v31, %v163_v41 }
 0x19e   :  { %v172_v44 = vsel %vm169_vm9, %v171_v42, %v167_v43 }
 0x19f   :  { %v174_v45 = vmul.f32 %v279_v18, %v172_v44 }
 0x1a1   :  { %268 = vmatmul.msk.f32.vlgmr.msra.gmra.mxu3 %vm126_vm1, %v174_v45  ;;  %222 = vst.msk [vmem:[#allocation9 + $0x8] sm:$0xff] %vm126_vm1, %v174_v45 }
 0x1a2   :  { %250 = dma.vmem_to_hbm [thread:$0]  %s243_s30, 256, %s245_s7, [#allocation10], %s413_s23, %s413_s23, %s414_s24  }
 0x21c   :  { %v195_v46 = vpop.f32.mrf.mxu2 }
 0x21d   :  { %223 = vst.msk [vmem:[#allocation8] sm:$0xff] %vm73_vm0, %v195_v46 }
 0x224   :  { %v218_v47 = vpop.f32.mrf.mxu3 }
 0x225   :  { %224 = vst.msk [vmem:[#allocation8 + $0x8] sm:$0xff] %vm73_vm0, %v218_v47 }
 0x226   :  { %237 = dma.vmem_to_hbm [thread:$0]  %s230_s9, 256, %s232_s12, [#allocation4], %s413_s23, %s413_s23, %s414_s24  }
 0x227   :  { %408 = dma.done.wait [#allocation4], 256  }
 0x228   :  { %409 = vsyncadd [#allocation4], 4294967040 }
 0x229   :  { %410 = dma.done.wait [#allocation10], 256  }
 0x22a   :  { %411 = vsyncadd [#allocation10], 4294967040 }
 0x22b   :  { %259 = vsyncpa [#allocation3], 1 }
 0x22c   :  { %260 = vsyncpa [#allocation6], 1 }
 0x22d   :  { %261 = vsyncpa [#allocation4], 1 }
 0x22e   :  { %262 = vsyncpa [#allocation10], 1 }

</bundles_post_ra>
